<compile_context>
chip_gen: v5e
topology: v5e:2x2
jax: 0.10.0
libtpu: 0.0.40
codegen_flags: <defaults>
</compile_context>

<pallas_src>
import math

import jax
import jax.numpy as jnp
from jax.experimental import pallas as pl
from jax.experimental.pallas import tpu as pltpu

_MIB = 1024 * 1024


# ---------------------------------------------------------------------------
# Kernel
# ---------------------------------------------------------------------------
def data_embedding_kernel(x_ref, w_ref, pe_ref, o_ref):
    # x_ref : (TB, L, C)  w_ref : (3C, D)  pe_ref : (L, D)  o_ref : (TB, L, D)
    tb, seq, c_in = x_ref.shape
    d_model = o_ref.shape[-1]

    # Circular shifts along the sequence (sublane) axis on the XLU rotate slot.
    # f32 is the canonical 32-bit sublane-rotate path; the up/down casts are
    # negligible VPU work on a C_in-lane-wide array and round-trip bf16 exactly.
    x = x_ref[...].astype(jnp.float32)                     # (TB, L, C)
    x_prev = pltpu.roll(x, shift=1, axis=1)                # x[(t-1) % L]
    x_next = pltpu.roll(x, shift=seq - 1, axis=1)          # x[(t+1) % L]

    # All three conv taps in a single MXU matmul: (TB*L, 3C) @ (3C, D).
    # K = 3*C_in barely fills the systolic array, but FLOPs are negligible and the
    # kernel is HBM-writeback bound, so one dot per step is optimal.
    # (seq should be a multiple of 8 so the leading-dim merge is a free relabel.)
    lhs = jnp.concatenate([x_prev, x, x_next], axis=-1).astype(w_ref.dtype)
    lhs = lhs.reshape(tb * seq, 3 * c_in)
    acc = jnp.dot(lhs, w_ref[...], preferred_element_type=jnp.float32)  # (TB*L, D)

    # Positional add in f32 (pe may be stored bf16), single cast on the store.
    out = acc.reshape(tb, seq, d_model) + pe_ref[...].astype(jnp.float32)
    o_ref[...] = out.astype(o_ref.dtype)


# ---------------------------------------------------------------------------
# Generation-aware configuration
# ---------------------------------------------------------------------------
def _generation_config():
    """Return (vmem_limit_bytes, min_grid_steps) for the local TPU generation.

    v7x   : 64 MiB VMEM/TC, 2 TCs -> cap the scoped limit at 48 MiB and require
            >= 4 grid steps (2 per core) so each core still double-buffers.
    v5e/6e: 128 MiB physical -> spend it on larger batch tiles, >= 2 steps.
    Unknown (no device query available): conservative values safe everywhere.
    """
    try:
        vmem_cap = int(pltpu.get_tpu_info().vmem_capacity_bytes)
    except Exception:
        vmem_cap = None
    if vmem_cap is not None and vmem_cap <= 64 * _MIB:      # v7x-class TensorCore
        return 48 * _MIB, 4
    if vmem_cap is not None:                                 # v5e / v6e (128 MiB)
        return 64 * _MIB, 2
    return 32 * _MIB, 4                                      # unknown: safe defaults


def _auto_tb(batch, per_row_bytes, budget_bytes, min_grid):
    """Largest batch-tile (divisor of B) fitting the VMEM budget, preferring
    configurations that leave >= min_grid grid steps."""
    divs = [d for d in range(1, batch + 1) if batch % d == 0]
    fits = [d for d in divs if d * per_row_bytes <= budget_bytes] or [1]
    pref = [d for d in fits if batch // d >= min_grid]
    return max(pref) if pref else max(fits)


# ---------------------------------------------------------------------------
# Wrappers
# ---------------------------------------------------------------------------
def prepare_data_embedding_params(conv_w, pe_full, seq_len, *,
                                  compute_dtype=jnp.bfloat16, pe_dtype=None):
    """One-time prep (hoisted out of the per-call path).

    conv_w : (D, C, 3) PyTorch Conv1d weight layout.
    Returns (w_fused (3C, D_pad), pe (L, D_pad), d_model) with D padded up to a
    multiple of 128 so the kernel's output stays lane-dense (unmasked vst).
    Row ordering of w_fused matches the in-kernel concat [x_{t-1}, x_t, x_{t+1}].
    """
    d_model, c_in, k = conv_w.shape
    assert k == 3, "TokenEmbedding uses kernel_size=3"
    pe_dtype = compute_dtype if pe_dtype is None else pe_dtype

    w_fused = jnp.transpose(conv_w, (2, 1, 0)).reshape(3 * c_in, d_model)
    pe = pe_full[:seq_len, :]

    d_pad = pl.cdiv(d_model, 128) * 128
    if d_pad != d_model:
        w_fused = jnp.pad(w_fused, ((0, 0), (0, d_pad - d_model)))
        pe = jnp.pad(pe, ((0, 0), (0, d_pad - d_model)))
    return w_fused.astype(compute_dtype), pe.astype(pe_dtype), d_model


def data_embedding(x, w_fused, pe, *, d_model=None, tb=None, out_dtype=None):
    """x: (B, L, C).  w_fused: (3C, D_pad), pe: (L, D_pad) from prepare_*.
    Returns (B, L, d_model)."""
    batch, seq, c_in = x.shape
    kc, d_pad = w_fused.shape
    assert kc == 3 * c_in and pe.shape == (seq, d_pad)
    d_model = d_pad if d_model is None else d_model
    # Output defaults to the compute dtype (bf16 on the recommended path) since the
    # kernel time is essentially the output HBM writeback.
    out_dtype = jnp.dtype(w_fused.dtype) if out_dtype is None else jnp.dtype(out_dtype)

    x_c = x.astype(w_fused.dtype)  # bf16 data movement on v6e/v7x; f32 also supported
    vmem_limit, min_grid = _generation_config()

    if tb is None:
        x_it = jnp.dtype(x_c.dtype).itemsize
        out_it = out_dtype.itemsize
        # Per batch-row VMEM per step: double-buffered x/out DMA tiles plus ~2 f32
        # intermediates of the output-tile size (MXU acc + pe-added result).
        per_row = seq * (2 * c_in * x_it + 2 * d_pad * out_it + 2 * d_pad * 4)
        # Resident (constant index-map, default double-buffered) w_fused + pe.
        resident = 2 * (w_fused.size * w_fused.dtype.itemsize
                        + pe.size * pe.dtype.itemsize)
        budget = max(0, int(vmem_limit * 0.75) - resident)
        tb = _auto_tb(batch, per_row, budget, min_grid)
    assert batch % tb == 0, "tb must divide the batch size"

    out = pl.pallas_call(
        data_embedding_kernel,
        out_shape=jax.ShapeDtypeStruct((batch, seq, d_pad), out_dtype),
        grid_spec=pltpu.PrefetchScalarGridSpec(
            num_scalar_prefetch=0,
            grid=(batch // tb,),
            in_specs=[
                pl.BlockSpec((tb, seq, c_in), lambda b: (b, 0, 0)),
                pl.BlockSpec((kc, d_pad), lambda b: (0, 0)),
                pl.BlockSpec((seq, d_pad), lambda b: (0, 0)),
            ],
            out_specs=pl.BlockSpec((tb, seq, d_pad), lambda b: (b, 0, 0)),
        ),
        compiler_params=pltpu.CompilerParams(
            dimension_semantics=("parallel",),
            vmem_limit_bytes=vmem_limit,
        ),
    )(x_c, w_fused, pe)
    return out if d_model == d_pad else out[..., :d_model]


# ---------------------------------------------------------------------------
# Parameter construction (matches the PyTorch module's init / buffers)
# ---------------------------------------------------------------------------
def make_positional_embedding(d_model, max_len=5000):
    position = jnp.arange(0, max_len, dtype=jnp.float32)[:, None]
    div_term = jnp.exp(jnp.arange(0, d_model, 2, dtype=jnp.float32)
                       * -(math.log(10000.0) / d_model))
    pe = jnp.zeros((max_len, d_model), dtype=jnp.float32)
    pe = pe.at[:, 0::2].set(jnp.sin(position * div_term))
    pe = pe.at[:, 1::2].set(jnp.cos(position * div_term))
    return pe


def make_conv_weight(key, c_in, d_model):
    # kaiming_normal_(mode='fan_in', nonlinearity='leaky_relu')  (a=0 -> gain=sqrt(2))
    fan_in = c_in * 3
    std = math.sqrt(2.0) / math.sqrt(fan_in)
    return jax.random.normal(key, (d_model, c_in, 3), dtype=jnp.float32) * std


# ---------------------------------------------------------------------------
# Pure-JAX reference of the PyTorch forward (dropout p=0.0 -> identity)
# ---------------------------------------------------------------------------
def reference(x, conv_w, pe_full, compute_dtype=jnp.float32):
    batch, seq, c_in = x.shape
    w = jnp.transpose(conv_w, (2, 1, 0)).reshape(3 * c_in, -1).astype(compute_dtype)
    x_prev = jnp.roll(x, 1, axis=1)
    x_next = jnp.roll(x, -1, axis=1)
    lhs = jnp.concatenate([x_prev, x, x_next], axis=-1).astype(compute_dtype)
    out = jnp.einsum("blk,kd->bld", lhs, w, preferred_element_type=jnp.float32)
    return out + pe_full[None, :seq, :]


if __name__ == "__main__":
    key = jax.random.PRNGKey(0)
    k_x, k_w, k_w2 = jax.random.split(key, 3)

    # Small but TPU-friendly shapes: lane-dense d_model, sublane-aligned seq.
    B, L, C_in, D = 8, 16, 4, 128
    x = jax.random.normal(k_x, (B, L, C_in), dtype=jnp.float32)
    conv_w = make_conv_weight(k_w, C_in, D)
    pe_full = make_positional_embedding(D, max_len=5000)

    # --- f32 path: bit-faithful to the PyTorch module ---
    w32, pe32, d32 = prepare_data_embedding_params(
        conv_w, pe_full, L, compute_dtype=jnp.float32)
    out_f32 = jax.block_until_ready(data_embedding(x, w32, pe32, d_model=d32))
    ref_f32 = reference(x, conv_w, pe_full, compute_dtype=jnp.float32)
    assert out_f32.shape == (B, L, D) and out_f32.dtype == jnp.float32
    assert jnp.max(jnp.abs(out_f32 - ref_f32)) < 1e-4

    # --- recommended bf16 data-movement path: bf16 x / w / pe storage, bf16 output,
    #     f32 MXU accumulation and f32 positional add in-kernel ---
    wbf, pebf, dbf = prepare_data_embedding_params(
        conv_w, pe_full, L, compute_dtype=jnp.bfloat16)
    out_bf = jax.block_until_ready(data_embedding(x, wbf, pebf, d_model=dbf))
    ref_bf = reference(x, conv_w, pe_full, compute_dtype=jnp.bfloat16)
    assert out_bf.shape == (B, L, D) and out_bf.dtype == jnp.bfloat16
    # Tolerance covers bf16 output + bf16 pe-table quantization.
    assert jnp.max(jnp.abs(out_bf.astype(jnp.float32) - ref_bf)) < 5e-2

    # --- non-128-multiple d_model: exercises the pad-to-lane-dense + slice path ---
    D2 = 96
    conv_w2 = make_conv_weight(k_w2, C_in, D2)
    pe_full2 = make_positional_embedding(D2, max_len=5000)
    w2, pe2, d2 = prepare_data_embedding_params(
        conv_w2, pe_full2, L, compute_dtype=jnp.float32)
    out2 = jax.block_until_ready(data_embedding(x, w2, pe2, d_model=d2))
    ref2 = reference(x, conv_w2, pe_full2, compute_dtype=jnp.float32)
    assert out2.shape == (B, L, D2)
    assert jnp.max(jnp.abs(out2 - ref2)) < 1e-4

    # TODO(synk): dropout with p > 0 would need pltpu.prng_seed / prng_random_bits;
    # the module defaults to p=0.0 (identity), which is what is implemented.
    print("KERNEL_OK")
</pallas_src>

<mosaic_0001>
module attributes {stable_mosaic.version = 11 : i64} {
  func.func @data_embedding_kernel(%arg0: i32, %arg1: memref<2x16x4xf32, #tpu.memory_space<vmem>>, %arg2: memref<12x128xf32, #tpu.memory_space<vmem>>, %arg3: memref<16x128xf32, #tpu.memory_space<vmem>>, %arg4: memref<2x16x128xf32, #tpu.memory_space<vmem>>) attributes {dimension_semantics = [#tpu.dimension_semantics<parallel>], iteration_bounds = array<i64: 4>, scalar_prefetch = 0 : i64, scratch_operands = 0 : i64, tpu.core_type = #tpu.core_type<tc>, window_params = [{transform_indices = @transform_0, window_bounds = array<i64: 2, 16, 4>}, {pipeline_mode = #tpu.pipeline_mode<synchronous>, transform_indices = @transform_1, window_bounds = array<i64: 12, 128>}, {pipeline_mode = #tpu.pipeline_mode<synchronous>, transform_indices = @transform_2, window_bounds = array<i64: 16, 128>}, {transform_indices = @transform_3, window_bounds = array<i64: 2, 16, 128>}]} {
    %c0 = arith.constant 0 : index
    %c0_0 = arith.constant 0 : index
    %c0_1 = arith.constant 0 : index
    %0 = vector.load %arg1[%c0, %c0_0, %c0_1] : memref<2x16x4xf32, #tpu.memory_space<vmem>>, vector<2x16x4xf32>
    %c1_i32 = arith.constant 1 : i32
    %1 = tpu.dynamic_rotate %0 by %c1_i32 dim 1 : vector<2x16x4xf32>, i32 -> vector<2x16x4xf32>
    %c15_i32 = arith.constant 15 : i32
    %2 = tpu.dynamic_rotate %0 by %c15_i32 dim 1 : vector<2x16x4xf32>, i32 -> vector<2x16x4xf32>
    %3 = tpu.concatenate %1, %0, %2 in 2 : vector<2x16x4xf32>, vector<2x16x4xf32>, vector<2x16x4xf32> -> vector<2x16x12xf32>
    %4 = vector.shape_cast %3 : vector<2x16x12xf32> to vector<32x12xf32>
    %c0_2 = arith.constant 0 : index
    %c0_3 = arith.constant 0 : index
    %5 = vector.load %arg2[%c0_2, %c0_3] : memref<12x128xf32, #tpu.memory_space<vmem>>, vector<12x128xf32>
    %cst = arith.constant dense<0.000000e+00> : vector<32x128xf32>
    %6 = tpu.matmul %4, %5, %cst {dimension_numbers = #tpu.dot_dimension_numbers<[1], [0], [0], [1], [0, 0, 1, 1], [], []>} : vector<32x12xf32>, vector<12x128xf32>, vector<32x128xf32> -> vector<32x128xf32>
    %7 = vector.shape_cast %6 : vector<32x128xf32> to vector<2x16x128xf32>
    %c0_4 = arith.constant 0 : index
    %c0_5 = arith.constant 0 : index
    %8 = vector.load %arg3[%c0_4, %c0_5] : memref<16x128xf32, #tpu.memory_space<vmem>>, vector<16x128xf32>
    %9 = vector.shape_cast %8 : vector<16x128xf32> to vector<1x16x128xf32>
    %10 = vector.broadcast %9 : vector<1x16x128xf32> to vector<2x16x128xf32>
    %11 = arith.addf %7, %10 : vector<2x16x128xf32>
    %c0_6 = arith.constant 0 : index
    %c0_7 = arith.constant 0 : index
    %c0_8 = arith.constant 0 : index
    %12 = vector.load %arg4[%c0_6, %c0_7, %c0_8] : memref<2x16x128xf32, #tpu.memory_space<vmem>>, vector<2x16x128xf32>
    tpu.vector_store %arg4[%c0_6, %c0_7, %c0_8], %11 {strides = array<i32>} : memref<2x16x128xf32, #tpu.memory_space<vmem>>, vector<2x16x128xf32>,
    return
  }
  func.func @transform_0(%arg0: i32) -> (i32, i32, i32) {
    %c0_i32 = arith.constant 0 : i32
    %c0_i32_0 = arith.constant 0 : i32
    %c0_i32_1 = arith.constant 0 : i32
    return %arg0, %c0_i32, %c0_i32_0 : i32, i32, i32
  }
  func.func @transform_1(%arg0: i32) -> (i32, i32) {
    %c0_i32 = arith.constant 0 : i32
    %c0_i32_0 = arith.constant 0 : i32
    %c0_i32_1 = arith.constant 0 : i32
    return %c0_i32, %c0_i32_0 : i32, i32
  }
  func.func @transform_2(%arg0: i32) -> (i32, i32) {
    %c0_i32 = arith.constant 0 : i32
    %c0_i32_0 = arith.constant 0 : i32
    %c0_i32_1 = arith.constant 0 : i32
    return %c0_i32, %c0_i32_0 : i32, i32
  }
  func.func @transform_3(%arg0: i32) -> (i32, i32, i32) {
    %c0_i32 = arith.constant 0 : i32
    %c0_i32_0 = arith.constant 0 : i32
    %c0_i32_1 = arith.constant 0 : i32
    return %arg0, %c0_i32, %c0_i32_0 : i32, i32, i32
  }
}

</mosaic_0001>

<bundles_post_ra>
// kernel: tpu_custom_call.1
= control target key start
LH: loop header
LB: loop body
LE: loop exit
PB: predicated region body
PF: predicated region fallthrough
CT: control target
= control target key end

     0   :  { %8 = vsyncpa [#allocation3], 0  ;;  %s656_s0 = inlined_call_operand.vmem [shape: f32[8,16,4], index: 0, kind: input, shape index: {}]   ;;  %s657_s1 = inlined_call_operand.vmem [shape: f32[12,128], index: 1, kind: input, shape index: {}]   ;;  %s658_s2 = inlined_call_operand.vmem [shape: f32[16,128], index: 2, kind: input, shape index: {}]   ;;  %s659_s3 = inlined_call_operand.hbm [shape: f32[8,16,128], index: 3, kind: output, shape index: {}]  }
   0x1   :  { %10 = vsyncpa [#allocation3 + $0x1], 0  ;;  %s535_s12 = smov 0   ;;  %s537_s13 = smov 0  }
   0x2   :  { %s539_s14 = smov 0   ;;  %s541_s15 = smov 0  }
   0x3 LB: > { %s556_s16 = sadd.s32 4294967295, %s510_s15   ;;  %s378_s17 = sadd.s32 4294967294, %s510_s15   ;;  %s510_s15 = sphi %s541_s15, %s665_s15   ;;  %s506_s14 = sphi %s539_s14, %s664_s14   ;;  %s502_s13 = sphi %s537_s13, %s663_s13   ;;  %s498_s12 = sphi %s535_s12, %s662_s12  }
   0x4   : > { %s560_s18 = sadd.s32 1, %s510_s15   ;;  %s91_s19 = sadd.s32 1, %s506_s14 }
   0x5   : > { %s88_s20 = ssub.s32 %s510_s15, %s560_s18  ;;  %p101_p0 = scmp.ne.s32.totalorder %s506_s14, %s502_s13 }
   0x6   : > { %p89_p1 = scmp.eq.s32.totalorder %s88_s20, 0  ;;  %p102_p2 = scmp.eq.s32.totalorder %s556_s16, 3 }
   0x7   : > { %p107_p3 = scmp.ne.s32.totalorder %s502_s13, %s498_s12  ;;  %p108_p4 = scmp.eq.s32.totalorder %s378_s17, 3 }
   0x8   : > { %s571_s21 = scalar_select %p89_p1, %s506_s14, %s91_s19  }
   0x9   : > { %p573_p5 = por %p102_p2, %p101_p0  ;;  %p577_p6 = por %p108_p4, %p107_p3 }
   0xa   : > { %p381_p7 = scmp.ge.s32.totalorder %s510_s15, 1  ;;  %p142_p8 = scmp.lt.s32.totalorder %s510_s15, 5 }
   0xc   : > { %p143_p9 = pnand %p381_p7, %p142_p8 }
   0xd   : > { %s383_s24 = sshll.u32 (!%p143_p9), %s556_s16, 1  ;;  %s512_s29 = smov (!%p143_p9), 4  }
   0xe   : > { %146 = sbr.rel (%p143_p9) target bundleno = 290 (0x122), region = 32  ;;  %p168_p10 = scmp.lt.s32.totalorder (!%p143_p9), %s383_s24, 7 }
   0xf   : > { %s513_s30 = smov (!%p143_p9), 8   ;;  %s164_s8 = sand.u32 (!%p143_p9), 1, %s502_s13  }
  0x10   : > { %s382_s9 = sshll.u32 (!%p143_p9), %s164_s8, 5  ;;  %s399_s17 = sshll.u32 (!%p143_p9), %s556_s16, 5 }
  0x11   : > { %s166_s19 = scalar_lea.vmem (!%p143_p9), [#allocation2], %s382_s9  ;;  %s300_s16 = scalar_lea.sflag (!%p143_p9), [#allocation3], %s164_s8 }
  0x12   : > { %s468_s9 = scalar_lea.hbm (!%p143_p9), %s659_s3, 128 }
  0x13   : > { %v183_v0 = vlaneseq  ;;  %s667_s24 = smov (!%p168_p10, %s383_s24), 7  ;;  %v242_v17 = vld [vmem:[%s657_s1 + $0x8] sm:$0xf]  ;;  %vm256_vm2 = vcmask 1043456   ;;  %v241_v18 = vld [vmem:[%s657_s1] sm:$0xff]  ;;  %vm231_vm3 = vcmask 31744  }
  0x14   : > { %s397_s25 = sshll.u32 %s667_s24, 4  ;;  %401 = vmatpush.msk.msra.mxu2 %vm256_vm2, %v242_v17  ;;  %402 = vmatpush.msk.msra.mxu3 %vm256_vm2, %v242_v17  ;;  %vm236_vm4 = vcmask 64512   ;;  %vm243_vm5 = vcmask 97280   ;;  %v289_v40 = vld [vmem:[%s658_s2] sm:$0xff]  ;;  %v290_v43 = vld [vmem:[%s658_s2 + $0x8] sm:$0xff] }
  0x15   : > { %v184_v1 = vshrl.u32 %v183_v0, 7  ;;  %s172_s28 = scalar_lea.vmem %s656_s0, %s397_s25  ;;  %386 = vmatpush.msk.msra.mxu0 %vm256_vm2, %v242_v17  ;;  %400 = vmatpush.msk.msra.mxu1 %vm256_vm2, %v242_v17  ;;  %s312_s25 = scalar_lea.hbm %s659_s3, %s399_s17 }
  0x16   : > { %v177_v2 = vld [vmem:[%s172_s28 + $0x10] sm:$0xff]  ;;  %v178_v3 = vld [vmem:[%s172_s28 + $0x18] sm:$0xff]  ;;  %v175_v4 = vld [vmem:[%s172_s28] sm:$0xff]  ;;  %404 = vmatpush.msra.mxu2 %v241_v18  ;;  %405 = vmatpush.msra.mxu3 %v241_v18 }
  0x17   : > { %vm194_vm0 = vcmp.lt.s32.totalorder %v184_v1, 7  ;;  %207 = vrot.lane.b32.xlu0 %v177_v2, %s512_s29  ;;  %v191_v5 = vrot.slane %v177_v2, 1  ;;  %v193_v6 = vrot.slane %v178_v3, 1  ;;  %203 = vrot.lane.b32.xlu2 %v175_v4, %s512_s29  ;;  %v176_v8 = vld [vmem:[%s172_s28 + $0x8] sm:$0xff]  ;;  %v190_v10 = vrot.slane %v175_v4, 1  ;;  %s313_s28 = sshll.u32 %s166_s19, 4  ;;  %s314_s28 = int_to_ptr.vmem [resolvable:$true] %s313_s28 }
  0x18   : > { %v192_v11 = vrot.slane %v176_v8, 1  ;;  %v180_v14 = vrot.slane %v177_v2, 7  ;;  %v182_v15 = vrot.slane %v178_v3, 7  ;;  %vm185_vm1 = vcmp.lt.s32.totalorder %v184_v1, 1  ;;  %275 = vmatpush.msra.mxu0 %v241_v18  ;;  %403 = vmatpush.msra.mxu1 %v241_v18 }
  0x19   : > { %v196_v7 = vsel %vm194_vm0, %v191_v5, %v193_v6  ;;  %v198_v9 = vsel %vm194_vm0, %v193_v6, %v191_v5  ;;  %v181_v27 = vrot.slane %v176_v8, 7  ;;  %v179_v28 = vrot.slane %v175_v4, 7 }
  0x1a   : > { %223 = vrot.lane.b32.xlu1 %v196_v7, %s513_s30  ;;  %v195_v12 = vsel %vm194_vm0, %v190_v10, %v192_v11  ;;  %v197_v13 = vsel %vm194_vm0, %v192_v11, %v190_v10  ;;  %v189_v16 = vsel %vm185_vm1, %v182_v15, %v180_v14  ;;  %v187_v19 = vsel %vm185_vm1, %v180_v14, %v182_v15 }
  0x1b   : > { %v188_v31 = vsel %vm185_vm1, %v181_v27, %v179_v28  ;;  %v186_v33 = vsel %vm185_vm1, %v179_v28, %v181_v27 }
  0x1f   : > { %209 = vrot.lane.b32.xlu0 %v178_v3, %s512_s29  ;;  %205 = vrot.lane.b32.xlu2 %v176_v8, %s512_s29  ;;  %s315_s29 = sshll.u32 %s312_s25, 4  ;;  %s316_s29 = int_to_ptr.hbm [resolvable:$true] %s315_s29 }
  0x20   : > { %s462_s4 = sshra.s32 %s316_s29, 4  ;;  %s463_s4 = int_to_ptr.hbm [resolvable:$true] %s462_s4 }
  0x21   : > { %s464_s5 = scalar_lea.hbm %s463_s4, 32  ;;  %p469_p0 = scmp.lt.s32.totalorder %s463_s4, %s659_s3 }
  0x22   : > { %225 = vrot.lane.b32.xlu1 %v198_v9, %s513_s30  ;;  %p465_p11 = scmp.ne.s32.totalorder %s463_s4, %s464_s5  ;;  %p470_p1 = scmp.lt.s32.totalorder %s468_s9, %s464_s5 }
  0x24   : > { %p466_p12 = pnand %p465_p11, %p573_p5  ;;  %p471_p2 = por %p470_p1, %p469_p0 }
  0x26   : > { %p467_p13 = pneg %p466_p12 }
  0x27   : > { %219 = vrot.lane.b32.xlu0 %v195_v12, %s513_s30 }
  0x28   : > { %p472_p3 = pnand %p471_p2, %p467_p13 }
  0x2a   : > { %221 = vrot.lane.b32.xlu1 %v197_v13, %s513_s30 }
  0x71   : > { %v204_v24 = vpop.permute.xlu2 %203 }
  0x72   : > { %v232_v34 = vsel %vm231_vm3, %v188_v31, %v204_v24 }
  0x79   : > { %v206_v32 = vpop.permute.xlu2 %205 }
  0x7a   : > { %v233_v36 = vsel %vm231_vm3, %v186_v33, %v206_v32 }
  0x89   : > { %v208_v20 = vpop.permute.xlu0 %207 }
  0x8a   : > { %v234_v21 = vsel %vm231_vm3, %v189_v16, %v208_v20 }
  0x8c   : > { %v224_v22 = vpop.permute.xlu1 %223 }
  0x8d   : > { %v239_v23 = vsel %vm236_vm4, %v234_v21, %v224_v22 }
  0x8e   : > { %389 = vmatmul.msk.f32.vlgmr.msra.gmra.mxu2 %vm243_vm5, %v239_v23 }
  0x91   : > { %v210_v25 = vpop.permute.xlu0 %209 }
  0x92   : > { %v235_v26 = vsel %vm231_vm3, %v187_v19, %v210_v25 }
  0x94   : > { %v226_v29 = vpop.permute.xlu1 %225 }
  0x95   : > { %v240_v30 = vsel %vm236_vm4, %v235_v26, %v226_v29 }
  0x96   : > { %390 = vmatmul.msk.f32.vlgmr.msra.gmra.mxu3 %vm243_vm5, %v240_v30 }
  0x99   : > { %v220_v35 = vpop.permute.xlu0 %219 }
  0x9a   : > { %v237_v37 = vsel %vm236_vm4, %v232_v34, %v220_v35 }
  0x9b   : > { %387 = vmatmul.msk.f32.vlgmr.msra.gmra.mxu0 %vm243_vm5, %v237_v37 }
  0x9c   : > { %v222_v38 = vpop.permute.xlu1 %221 }
  0x9d   : > { %v238_v39 = vsel %vm236_vm4, %v233_v36, %v222_v38 }
  0x9e   : > { %388 = vmatmul.msk.f32.vlgmr.msra.gmra.mxu1 %vm243_vm5, %v238_v39 }
 0x111   : > { %v283_v41 = vpop.f32.mrf.mxu2 }
 0x112   : > { %v293_v42 = vadd.f32 %v289_v40, %v283_v41 }
 0x114   : > { %297 = vst [vmem:[%s166_s19 + $0x10] sm:$0xff] %v293_v42 }
 0x118   : > { %v277_v44 = vpop.f32.mrf.mxu0 }
 0x119   : > { %v291_v45 = vadd.f32 %v289_v40, %v277_v44  ;;  %v286_v46 = vpop.f32.mrf.mxu3 }
 0x11a   : > { %v294_v47 = vadd.f32 %v290_v43, %v286_v46 }
 0x11b   : > { %295 = vst [vmem:[%s166_s19] sm:$0xff] %v291_v45  ;;  %v280_v48 = vpop.f32.mrf.mxu1 }
 0x11c   : > { %298 = vst [vmem:[%s166_s19 + $0x18] sm:$0xff] %v294_v47  ;;  %v292_v49 = vadd.f32 %v290_v43, %v280_v48 }
 0x11e   : > { %296 = vst [vmem:[%s166_s19 + $0x8] sm:$0xff] %v292_v49 }
 0x11f   : > { %475 = shalt.err (!%p472_p3)
}
 0x120   : > { %s514_s8 = smov 128  }
 0x121   : > { %406 = dma.vmem_to_hbm [thread:$0]  (%p573_p5), %s314_s28, 512, %s316_s29, %s300_s16, %s514_s8, %s514_s8, %s513_s30  }
 0x122 PF: > { %p412_p4 = scmp.ge.s32.totalorder %s510_s15, 2  ;;  %s330_s17 = sand.u32 1, %s498_s12  }
 0x123   : > { %s331_s19 = scalar_lea.sflag [#allocation3], %s330_s17 }
 0x124   : > { %p409_p7 = pnand %p412_p4, %p577_p6 }
 0x126   : > { %p410_p8 = pneg %p409_p7 }
 0x128   : > { %493 = dma.done.wait (%p410_p8), %s331_s19, 512  }
 0x129   : > { %495 = vsyncadd (%p410_p8), %s331_s19, 4294966784  ;;  %p13_p9 = scmp.ge.s32.totalorder %s560_s18, 6   ;;  %s662_s12 = smov %s502_s13 }
 0x12a   : > { %s663_s13 = smov %s506_s14  ;;  %s664_s14 = smov %s571_s21 }
 0x12b   : > { %s665_s15 = smov %s560_s18  ;;  %15 = sbr.rel (!%p13_p9) target bundleno = 3 (0x3), region = 67 }
 0x130   :  { %337 = vsyncpa [#allocation3], 1 }
 0x131   :  { %339 = vsyncpa [#allocation3 + $0x1], 1 }

</bundles_post_ra>
